<compile_context>
chip_gen: v6e
topology: v6e:2x2x1
jax: 0.10.0
libtpu: 0.0.40
codegen_flags: <defaults>
</compile_context>

<pallas_src>
import math
import numpy as np

import jax
import jax.numpy as jnp
from jax import lax
from jax.experimental import pallas as pl
from jax.experimental.pallas import tpu as pltpu


# ----------------------------------------------------------------------------
# Camera parameter setup (verbatim port of get_params from the PyTorch module).
# ----------------------------------------------------------------------------
def get_params(carlaTcam, carlaTveh):
    scale = 0.4
    eye = [0, 0, 0]
    for i in range(0, 3):
        eye[i] = carlaTcam[0][i] * scale
    pitch = math.radians(carlaTcam[1][0])
    yaw = math.radians(carlaTcam[1][1])
    roll = math.radians(carlaTcam[1][2])
    cam_direct = [math.cos(pitch) * math.cos(yaw),
                  math.cos(pitch) * math.sin(yaw),
                  math.sin(pitch)]
    cam_up = [math.cos(math.pi / 2 + pitch) * math.cos(yaw),
              math.cos(math.pi / 2 + pitch) * math.sin(yaw),
              math.sin(math.pi / 2 + pitch)]
    p_cam = eye
    p_dir = [eye[0] + cam_direct[0], eye[1] + cam_direct[1], eye[2] + cam_direct[2]]
    p_up = [eye[0] + cam_up[0], eye[1] + cam_up[1], eye[2] + cam_up[2]]
    p_l = [p_cam, p_dir, p_up]
    trans_p = []
    for p in p_l:
        if math.sqrt(p[0] ** 2 + p[1] ** 2) == 0:
            cosfi = 0
            sinfi = 0
        else:
            cosfi = p[0] / math.sqrt(p[0] ** 2 + p[1] ** 2)
            sinfi = p[1] / math.sqrt(p[0] ** 2 + p[1] ** 2)
        cossum = cosfi * math.cos(math.radians(carlaTveh[1][1])) + \
            sinfi * math.sin(math.radians(carlaTveh[1][1]))
        sinsum = math.cos(math.radians(carlaTveh[1][1])) * sinfi - \
            math.sin(math.radians(carlaTveh[1][1])) * cosfi
        trans_p.append([math.sqrt(p[0] ** 2 + p[1] ** 2) * cossum,
                        math.sqrt(p[0] ** 2 + p[1] ** 2) * sinsum,
                        p[2]])
    return (trans_p[0],
            [trans_p[1][0] - trans_p[0][0], trans_p[1][1] - trans_p[0][1], trans_p[1][2] - trans_p[0][2]],
            [trans_p[2][0] - trans_p[0][0], trans_p[2][1] - trans_p[0][1], trans_p[2][2] - trans_p[0][2]])


def _look_rotation(direction, up, eps=1e-5):
    # Rotation used by neural_renderer.look: rows are [x_axis, y_axis, z_axis].
    d = np.asarray(direction, dtype=np.float64)
    u = np.asarray(up, dtype=np.float64)
    z_axis = d / max(np.linalg.norm(d), eps)
    x = np.cross(u, z_axis)
    x_axis = x / max(np.linalg.norm(x), eps)
    y = np.cross(z_axis, x_axis)
    y_axis = y / max(np.linalg.norm(y), eps)
    return np.stack([x_axis, y_axis, z_axis], axis=0)  # (3, 3)


LANES = 128
FACE_STRIDE = 12   # A0 B0 C0 A1 B1 C1 A2 B2 C2 Zx Zy Zc   (f32 per face, SMEM table)


# ----------------------------------------------------------------------------
# Pallas kernel 1: face-coefficient prepass (lane-dense over faces).
# Fuses y-flip + look transform + perspective with the per-face rasterization
# coefficient math.  1/tan(viewing_angle) is folded into the x/y rotation rows.
#
# Per face f, for screen point (xp, yp):
#   edge_k(xp, yp) = yp * A_k + xp * B_k + C_k        (inside  <=>  all edge_k >= 0)
#   zdot(xp, yp)   = xp * Zx + yp * Zy + Zc  ( = 1 / interpolated depth )
# Back faces / degenerate faces (denom <= 0) are replaced by a null record that
# can never cover a pixel (A=B=0, C=-1, Z*=0), so the rasterizer is branch-free.
# ----------------------------------------------------------------------------
def _make_face_prep_kernel(eye, R, width):
    e0, e1, e2 = (float(v) for v in eye)
    inv_w = 1.0 / float(width)
    r = [[float(R[i, j]) for j in range(3)] for i in range(3)]
    r0 = [r[0][j] * inv_w for j in range(3)]   # x row / tan(angle)
    r1 = [r[1][j] * inv_w for j in range(3)]   # y row / tan(angle)
    r2 = r[2]

    def kernel(v_ref, o_ref):
        # v_ref block: (1, 9, Fpad)  rows = x0 y0 z0 x1 y1 z1 x2 y2 z2 (raw vertex coords).
        def xform(row):
            x = v_ref[0, row:row + 1, :]
            y = -v_ref[0, row + 1:row + 2, :]        # vs[:, :, 1] *= -1  (Render.forward)
            z = v_ref[0, row + 2:row + 3, :]
            tx = x - e0
            ty = y - e1
            tz = z - e2
            cx = r0[0] * tx + r0[1] * ty + r0[2] * tz   # already divided by tan(angle)
            cy = r1[0] * tx + r1[1] * ty + r1[2] * tz
            cz = r2[0] * tx + r2[1] * ty + r2[2] * tz
            inv_cz = 1.0 / cz
            return cx * inv_cz, cy * inv_cz, cz

        x0, y0, z0 = xform(0)
        x1, y1, z1 = xform(3)
        x2, y2, z2 = xform(6)

        dx10 = x1 - x0; dy10 = y1 - y0
        dx20 = x2 - x0; dy20 = y2 - y0
        # Barycentric denominator; strict > 0 is the back-face + degenerate-face cull.
        denom = dx10 * dy20 - dy10 * dx20
        valid = denom > 0.0
        inv_den = 1.0 / jnp.where(valid, denom, 1.0)
        iz0 = 1.0 / z0
        iz1 = 1.0 / z1
        iz2 = 1.0 / z2

        dx21 = x2 - x1; dy21 = y2 - y1
        dx02 = x0 - x2; dy02 = y0 - y2
        c0 = x0 * dy10 - y0 * dx10
        c1 = x1 * dy21 - y1 * dx21
        c2 = x2 * dy02 - y2 * dx02

        # Depth plane:  zdot = w0/z0 + w1/z1 + w2/z2  is affine in (xp, yp).
        zx = ((y1 - y2) * iz0 + (y2 - y0) * iz1 + (y0 - y1) * iz2) * inv_den
        zy = ((x2 - x1) * iz0 + (x0 - x2) * iz1 + (x1 - x0) * iz2) * inv_den
        zc = ((x1 * y2 - x2 * y1) * iz0 +
              (x2 * y0 - x0 * y2) * iz1 +
              (x0 * y1 - x1 * y0) * iz2) * inv_den

        zero = jnp.zeros_like(denom)
        neg1 = jnp.full_like(denom, -1.0)
        o_ref[0, 0:1, :] = jnp.where(valid, dx10, zero)    # A0
        o_ref[0, 1:2, :] = jnp.where(valid, -dy10, zero)   # B0
        o_ref[0, 2:3, :] = jnp.where(valid, c0, neg1)      # C0
        o_ref[0, 3:4, :] = jnp.where(valid, dx21, zero)    # A1
        o_ref[0, 4:5, :] = jnp.where(valid, -dy21, zero)   # B1
        o_ref[0, 5:6, :] = jnp.where(valid, c1, neg1)      # C1
        o_ref[0, 6:7, :] = jnp.where(valid, dx02, zero)    # A2
        o_ref[0, 7:8, :] = jnp.where(valid, -dy02, zero)   # B2
        o_ref[0, 8:9, :] = jnp.where(valid, c2, neg1)      # C2
        o_ref[0, 9:10, :] = jnp.where(valid, zx, zero)     # Zx
        o_ref[0, 10:11, :] = jnp.where(valid, zy, zero)    # Zy
        o_ref[0, 11:12, :] = jnp.where(valid, zc, zero)    # Zc

    return kernel


def face_prep(face_vertices, eye, R, width):
    """face_vertices: (B, nf, 3, 3) raw per-face vertex coords -> flat (B*nf*12,) coeff table."""
    B, nf = int(face_vertices.shape[0]), int(face_vertices.shape[1])
    Fpad = max(LANES, ((nf + LANES - 1) // LANES) * LANES)
    fv = face_vertices.astype(jnp.float32).reshape(B, nf, 9)
    fv = jnp.transpose(fv, (0, 2, 1))                                  # (B, 9, nf) lane-dense
    fv = jnp.pad(fv, ((0, 0), (0, 0), (0, Fpad - nf)))
    kernel = _make_face_prep_kernel(eye, R, width)
    coef = pl.pallas_call(
        kernel,
        out_shape=jax.ShapeDtypeStruct((B, FACE_STRIDE, Fpad), jnp.float32),
        grid=(B,),
        in_specs=[pl.BlockSpec((1, 9, Fpad), lambda b: (b, 0, 0))],
        out_specs=pl.BlockSpec((1, FACE_STRIDE, Fpad), lambda b: (b, 0, 0)),
        compiler_params=pltpu.CompilerParams(dimension_semantics=("parallel",)),
    )(fv)
    # Small XLA transpose: per-face contiguous stride-12 records for SMEM scalar indexing.
    coef = jnp.transpose(coef[:, :, :nf], (0, 2, 1))                   # (B, nf, 12)
    return coef.reshape(-1)


# ----------------------------------------------------------------------------
# Pallas kernel 2: silhouette rasterization (per-pixel coverage over faces).
# Pixel grid is lane-dense: (tile_rows, 128) f32 tiles of the flattened image.
# Branch-free face loop; coverage accumulated in the fori_loop carry and the
# output tile written exactly once.
# ----------------------------------------------------------------------------
def _make_rasterize_kernel(num_faces, image_size, tile_rows, near, far):
    S = int(image_size)
    inv_S = 1.0 / S
    inv_near = 1.0 / float(near)
    inv_far = 1.0 / float(far)
    TR = int(tile_rows)
    pix_per_block = TR * LANES

    def kernel(fc_ref, mask_ref):
        b = pl.program_id(0)
        j = pl.program_id(1)

        # Lane-dense pixel coordinates for this tile of the flattened image.
        flat = (j * pix_per_block
                + lax.broadcasted_iota(jnp.int32, (TR, LANES), 0) * LANES
                + lax.broadcasted_iota(jnp.int32, (TR, LANES), 1))
        yi = (flat // S).astype(jnp.float32)
        xi = (flat % S).astype(jnp.float32)
        # Vertical flip baked in: output row r uses source row (S - 1 - r).
        yp = (S - 1.0 - 2.0 * yi) * inv_S
        xp = (2.0 * xi + (1.0 - S)) * inv_S

        face_base = b * (num_faces * FACE_STRIDE)

        def body(f, acc):
            base = face_base + f * FACE_STRIDE
            a0 = fc_ref[base + 0]; b0 = fc_ref[base + 1]; c0 = fc_ref[base + 2]
            a1 = fc_ref[base + 3]; b1 = fc_ref[base + 4]; c1 = fc_ref[base + 5]
            a2 = fc_ref[base + 6]; b2 = fc_ref[base + 7]; c2 = fc_ref[base + 8]
            zx = fc_ref[base + 9]; zy = fc_ref[base + 10]; zc = fc_ref[base + 11]
            # Edge functions (precomputed coefficients -> 4 VPU ops each).
            e0 = yp * a0 + xp * b0 + c0
            e1 = yp * a1 + xp * b1 + c1
            e2 = yp * a2 + xp * b2 + c2
            inside = (e0 >= 0.0) & (e1 >= 0.0) & (e2 >= 0.0)
            # Depth test on zdot = 1/z_interp:  near < z < far  <=>  1/far < zdot < 1/near.
            zdot = xp * zx + yp * zy + zc
            covered = inside & (zdot > inv_far) & (zdot < inv_near)
            return jnp.where(covered, 1.0, acc)

        acc = lax.fori_loop(0, num_faces, body,
                            jnp.zeros((TR, LANES), jnp.float32), unroll=8)
        mask_ref[0, :, :] = acc

    return kernel


def rasterize_silhouettes(face_coef_flat, batch, num_faces, image_size, near, far):
    S = int(image_size)
    P = S * S
    rows = pl.cdiv(P, LANES)                         # 128-lane rows of the flattened image
    # Tile size sweep result from review: 32 rows (4 vregs) amortizes per-face scalar loads
    # and per-step overhead; shrink only to keep >=2 parallel grid items (v7x has 2 TCs)
    # and to avoid over-padding tiny images.
    tile_rows = 32
    while tile_rows > 8 and (rows < tile_rows or batch * pl.cdiv(rows, tile_rows) < 2):
        tile_rows //= 2
    rows_pad = pl.cdiv(rows, tile_rows) * tile_rows
    n_blocks = rows_pad // tile_rows
    kernel = _make_rasterize_kernel(num_faces, S, tile_rows, near, far)
    out = pl.pallas_call(
        kernel,
        out_shape=jax.ShapeDtypeStruct((batch, rows_pad, LANES), jnp.float32),
        grid=(batch, n_blocks),
        in_specs=[pl.BlockSpec(memory_space=pltpu.MemorySpace.SMEM)],
        out_specs=pl.BlockSpec((1, tile_rows, LANES), lambda b, j: (b, j, 0)),
        compiler_params=pltpu.CompilerParams(
            dimension_semantics=("parallel", "parallel")),
    )(face_coef_flat)
    # Lane-dense (B, rows_pad, 128) -> (B, S, S); contiguous reshape + slice, no reverse needed.
    return out.reshape(batch, rows_pad * LANES)[:, :P].reshape(batch, S, S)


# ----------------------------------------------------------------------------
# NeuralRenderer wrapper (forward pass of the PyTorch module, mask path).
# ----------------------------------------------------------------------------
class NeuralRendererPallas:
    def __init__(self, img_size=64):
        self.image_size = int(img_size)
        self.viewing_angle = 45
        self.near = 0.1
        self.far = 100.0
        eye, cam_dir, cam_up = get_params(((-25, 16, 20), (-45, 180, 0)),
                                          ((-45, 3, 0.8), (0, 0, 0)))
        self.eye = np.asarray(eye, dtype=np.float64)
        self.R = _look_rotation(cam_dir, cam_up)
        self.width = math.tan(math.radians(self.viewing_angle))
        # lighting params kept for parity with __init__; silhouettes do not use them
        self.light_intensity_ambient = 0.5
        self.light_intensity_directional = 0.5
        self.light_color_ambient = [1, 1, 1]
        self.light_color_directional = [1, 1, 1]
        self.light_direction = [0, 0, 1]

    def forward(self, vertices, faces, textures=None):
        if textures is not None:
            # TODO(synk): textured render path (texture sampling + lighting) not implemented.
            raise NotImplementedError("textured rendering is not implemented")
        B = vertices.shape[0]
        # Glue: fill_back=True (duplicate faces with reversed winding) + vertices_to_faces
        # gather (dynamic gather stays in XLA).
        faces_full = jnp.concatenate([faces, faces[:, :, ::-1]], axis=1)     # (B, 2F, 3)
        nf = int(faces_full.shape[1])
        face_v = jax.vmap(lambda v, f: v[f])(vertices.astype(jnp.float32),
                                             faces_full)                     # (B, 2F, 3, 3)
        # Pallas kernel 1: fused vertex transform + per-face coefficient prepass.
        coef_flat = face_prep(face_v, self.eye, self.R, self.width)          # (B*2F*12,)
        # Pallas kernel 2: per-pixel silhouette coverage (vertical flip baked into kernel).
        masks = rasterize_silhouettes(coef_flat, B, nf, self.image_size,
                                      self.near, self.far)
        return masks

    __call__ = forward


# ----------------------------------------------------------------------------
if __name__ == "__main__":
    key = jax.random.PRNGKey(0)
    B, N, F = 2, 8, 12
    S = 64

    renderer = NeuralRendererPallas(img_size=S)

    # Deterministic inputs: a random point cloud placed in front of the camera
    # (accounting for the y-flip that forward applies), plus random faces.
    kv, kf = jax.random.split(key)
    z_axis = renderer.R[2]
    center_flipped = renderer.eye + 6.0 * z_axis
    noise = jax.random.uniform(kv, (B, N, 3), minval=-1.0, maxval=1.0, dtype=jnp.float32)
    v_flipped = jnp.asarray(center_flipped, dtype=jnp.float32)[None, None, :] + noise
    vertices = v_flipped.at[:, :, 1].multiply(-1.0)          # undo the forward() y-flip
    faces = jax.random.randint(kf, (B, F, 3), 0, N, dtype=jnp.int32)

    masks = renderer.forward(vertices, faces)
    masks = jax.block_until_ready(masks)
    assert masks.shape == (B, S, S)
    assert masks.dtype == jnp.float32
    print("KERNEL_OK")
</pallas_src>

<mosaic_0001>
module attributes {stable_mosaic.version = 11 : i64} {
  func.func @kernel(%arg0: i32, %arg1: memref<1x9x128xf32, #tpu.memory_space<vmem>>, %arg2: memref<1x12x128xf32, #tpu.memory_space<vmem>>) attributes {dimension_semantics = [#tpu.dimension_semantics<parallel>], iteration_bounds = array<i64: 2>, scalar_prefetch = 0 : i64, scratch_operands = 0 : i64, tpu.core_type = #tpu.core_type<tc>, window_params = [{transform_indices = @transform_0, window_bounds = array<i64: 1, 9, 128>}, {transform_indices = @transform_1, window_bounds = array<i64: 1, 12, 128>}]} {
    %c0 = arith.constant 0 : index
    %c0_0 = arith.constant 0 : index
    %c0_1 = arith.constant 0 : index
    %0 = vector.load %arg1[%c0, %c0_0, %c0_1] : memref<1x9x128xf32, #tpu.memory_space<vmem>>, vector<1x1x128xf32>
    %1 = vector.shape_cast %0 : vector<1x1x128xf32> to vector<1x128xf32>
    %c0_2 = arith.constant 0 : index
    %c1 = arith.constant 1 : index
    %c0_3 = arith.constant 0 : index
    %2 = vector.load %arg1[%c0_2, %c1, %c0_3] : memref<1x9x128xf32, #tpu.memory_space<vmem>>, vector<1x1x128xf32>
    %3 = vector.shape_cast %2 : vector<1x1x128xf32> to vector<1x128xf32>
    %cst = arith.constant 0.000000e+00 : f32
    %4 = vector.broadcast %cst : f32 to vector<1x128xf32>
    %5 = arith.subf %4, %3 : vector<1x128xf32>
    %c0_4 = arith.constant 0 : index
    %c2 = arith.constant 2 : index
    %c0_5 = arith.constant 0 : index
    %6 = vector.load %arg1[%c0_4, %c2, %c0_5] : memref<1x9x128xf32, #tpu.memory_space<vmem>>, vector<1x1x128xf32>
    %7 = vector.shape_cast %6 : vector<1x1x128xf32> to vector<1x128xf32>
    %cst_6 = arith.constant -1.000000e+01 : f32
    %8 = vector.broadcast %cst_6 : f32 to vector<1x128xf32>
    %9 = arith.subf %1, %8 : vector<1x128xf32>
    %cst_7 = arith.constant 6.400000e+00 : f32
    %10 = vector.broadcast %cst_7 : f32 to vector<1x128xf32>
    %11 = arith.subf %5, %10 : vector<1x128xf32>
    %cst_8 = arith.constant 8.000000e+00 : f32
    %12 = vector.broadcast %cst_8 : f32 to vector<1x128xf32>
    %13 = arith.subf %7, %12 : vector<1x128xf32>
    %cst_9 = arith.constant 2.51214789E-15 : f32
    %14 = vector.broadcast %cst_9 : f32 to vector<1x128xf32>
    %15 = arith.mulf %14, %9 : vector<1x128xf32>
    %cst_10 = arith.constant -1.000000e+00 : f32
    %16 = vector.broadcast %cst_10 : f32 to vector<1x128xf32>
    %17 = arith.mulf %16, %11 : vector<1x128xf32>
    %18 = arith.addf %15, %17 : vector<1x128xf32>
    %cst_11 = arith.constant 0.000000e+00 : f32
    %19 = vector.broadcast %cst_11 : f32 to vector<1x128xf32>
    %20 = arith.mulf %19, %13 : vector<1x128xf32>
    %21 = arith.addf %18, %20 : vector<1x128xf32>
    %cst_12 = arith.constant -0.707106769 : f32
    %22 = vector.broadcast %cst_12 : f32 to vector<1x128xf32>
    %23 = arith.mulf %22, %9 : vector<1x128xf32>
    %cst_13 = arith.constant -1.77635684E-15 : f32
    %24 = vector.broadcast %cst_13 : f32 to vector<1x128xf32>
    %25 = arith.mulf %24, %11 : vector<1x128xf32>
    %26 = arith.addf %23, %25 : vector<1x128xf32>
    %cst_14 = arith.constant 0.707106769 : f32
    %27 = vector.broadcast %cst_14 : f32 to vector<1x128xf32>
    %28 = arith.mulf %27, %13 : vector<1x128xf32>
    %29 = arith.addf %26, %28 : vector<1x128xf32>
    %cst_15 = arith.constant -0.707106769 : f32
    %30 = vector.broadcast %cst_15 : f32 to vector<1x128xf32>
    %31 = arith.mulf %30, %9 : vector<1x128xf32>
    %cst_16 = arith.constant -1.77635684E-15 : f32
    %32 = vector.broadcast %cst_16 : f32 to vector<1x128xf32>
    %33 = arith.mulf %32, %11 : vector<1x128xf32>
    %34 = arith.addf %31, %33 : vector<1x128xf32>
    %cst_17 = arith.constant -0.707106769 : f32
    %35 = vector.broadcast %cst_17 : f32 to vector<1x128xf32>
    %36 = arith.mulf %35, %13 : vector<1x128xf32>
    %37 = arith.addf %34, %36 : vector<1x128xf32>
    %cst_18 = arith.constant 1.000000e+00 : f32
    %38 = vector.broadcast %cst_18 : f32 to vector<1x128xf32>
    %39 = arith.divf %38, %37 : vector<1x128xf32>
    %40 = arith.mulf %21, %39 : vector<1x128xf32>
    %41 = arith.mulf %29, %39 : vector<1x128xf32>
    %c0_19 = arith.constant 0 : index
    %c3 = arith.constant 3 : index
    %c0_20 = arith.constant 0 : index
    %42 = vector.load %arg1[%c0_19, %c3, %c0_20] : memref<1x9x128xf32, #tpu.memory_space<vmem>>, vector<1x1x128xf32>
    %43 = vector.shape_cast %42 : vector<1x1x128xf32> to vector<1x128xf32>
    %c0_21 = arith.constant 0 : index
    %c4 = arith.constant 4 : index
    %c0_22 = arith.constant 0 : index
    %44 = vector.load %arg1[%c0_21, %c4, %c0_22] : memref<1x9x128xf32, #tpu.memory_space<vmem>>, vector<1x1x128xf32>
    %45 = vector.shape_cast %44 : vector<1x1x128xf32> to vector<1x128xf32>
    %cst_23 = arith.constant 0.000000e+00 : f32
    %46 = vector.broadcast %cst_23 : f32 to vector<1x128xf32>
    %47 = arith.subf %46, %45 : vector<1x128xf32>
    %c0_24 = arith.constant 0 : index
    %c5 = arith.constant 5 : index
    %c0_25 = arith.constant 0 : index
    %48 = vector.load %arg1[%c0_24, %c5, %c0_25] : memref<1x9x128xf32, #tpu.memory_space<vmem>>, vector<1x1x128xf32>
    %49 = vector.shape_cast %48 : vector<1x1x128xf32> to vector<1x128xf32>
    %cst_26 = arith.constant -1.000000e+01 : f32
    %50 = vector.broadcast %cst_26 : f32 to vector<1x128xf32>
    %51 = arith.subf %43, %50 : vector<1x128xf32>
    %cst_27 = arith.constant 6.400000e+00 : f32
    %52 = vector.broadcast %cst_27 : f32 to vector<1x128xf32>
    %53 = arith.subf %47, %52 : vector<1x128xf32>
    %cst_28 = arith.constant 8.000000e+00 : f32
    %54 = vector.broadcast %cst_28 : f32 to vector<1x128xf32>
    %55 = arith.subf %49, %54 : vector<1x128xf32>
    %cst_29 = arith.constant 2.51214789E-15 : f32
    %56 = vector.broadcast %cst_29 : f32 to vector<1x128xf32>
    %57 = arith.mulf %56, %51 : vector<1x128xf32>
    %cst_30 = arith.constant -1.000000e+00 : f32
    %58 = vector.broadcast %cst_30 : f32 to vector<1x128xf32>
    %59 = arith.mulf %58, %53 : vector<1x128xf32>
    %60 = arith.addf %57, %59 : vector<1x128xf32>
    %cst_31 = arith.constant 0.000000e+00 : f32
    %61 = vector.broadcast %cst_31 : f32 to vector<1x128xf32>
    %62 = arith.mulf %61, %55 : vector<1x128xf32>
    %63 = arith.addf %60, %62 : vector<1x128xf32>
    %cst_32 = arith.constant -0.707106769 : f32
    %64 = vector.broadcast %cst_32 : f32 to vector<1x128xf32>
    %65 = arith.mulf %64, %51 : vector<1x128xf32>
    %cst_33 = arith.constant -1.77635684E-15 : f32
    %66 = vector.broadcast %cst_33 : f32 to vector<1x128xf32>
    %67 = arith.mulf %66, %53 : vector<1x128xf32>
    %68 = arith.addf %65, %67 : vector<1x128xf32>
    %cst_34 = arith.constant 0.707106769 : f32
    %69 = vector.broadcast %cst_34 : f32 to vector<1x128xf32>
    %70 = arith.mulf %69, %55 : vector<1x128xf32>
    %71 = arith.addf %68, %70 : vector<1x128xf32>
    %cst_35 = arith.constant -0.707106769 : f32
    %72 = vector.broadcast %cst_35 : f32 to vector<1x128xf32>
    %73 = arith.mulf %72, %51 : vector<1x128xf32>
    %cst_36 = arith.constant -1.77635684E-15 : f32
    %74 = vector.broadcast %cst_36 : f32 to vector<1x128xf32>
    %75 = arith.mulf %74, %53 : vector<1x128xf32>
    %76 = arith.addf %73, %75 : vector<1x128xf32>
    %cst_37 = arith.constant -0.707106769 : f32
    %77 = vector.broadcast %cst_37 : f32 to vector<1x128xf32>
    %78 = arith.mulf %77, %55 : vector<1x128xf32>
    %79 = arith.addf %76, %78 : vector<1x128xf32>
    %cst_38 = arith.constant 1.000000e+00 : f32
    %80 = vector.broadcast %cst_38 : f32 to vector<1x128xf32>
    %81 = arith.divf %80, %79 : vector<1x128xf32>
    %82 = arith.mulf %63, %81 : vector<1x128xf32>
    %83 = arith.mulf %71, %81 : vector<1x128xf32>
    %c0_39 = arith.constant 0 : index
    %c6 = arith.constant 6 : index
    %c0_40 = arith.constant 0 : index
    %84 = vector.load %arg1[%c0_39, %c6, %c0_40] : memref<1x9x128xf32, #tpu.memory_space<vmem>>, vector<1x1x128xf32>
    %85 = vector.shape_cast %84 : vector<1x1x128xf32> to vector<1x128xf32>
    %c0_41 = arith.constant 0 : index
    %c7 = arith.constant 7 : index
    %c0_42 = arith.constant 0 : index
    %86 = vector.load %arg1[%c0_41, %c7, %c0_42] : memref<1x9x128xf32, #tpu.memory_space<vmem>>, vector<1x1x128xf32>
    %87 = vector.shape_cast %86 : vector<1x1x128xf32> to vector<1x128xf32>
    %cst_43 = arith.constant 0.000000e+00 : f32
    %88 = vector.broadcast %cst_43 : f32 to vector<1x128xf32>
    %89 = arith.subf %88, %87 : vector<1x128xf32>
    %c0_44 = arith.constant 0 : index
    %c8 = arith.constant 8 : index
    %c0_45 = arith.constant 0 : index
    %90 = vector.load %arg1[%c0_44, %c8, %c0_45] : memref<1x9x128xf32, #tpu.memory_space<vmem>>, vector<1x1x128xf32>
    %91 = vector.shape_cast %90 : vector<1x1x128xf32> to vector<1x128xf32>
    %cst_46 = arith.constant -1.000000e+01 : f32
    %92 = vector.broadcast %cst_46 : f32 to vector<1x128xf32>
    %93 = arith.subf %85, %92 : vector<1x128xf32>
    %cst_47 = arith.constant 6.400000e+00 : f32
    %94 = vector.broadcast %cst_47 : f32 to vector<1x128xf32>
    %95 = arith.subf %89, %94 : vector<1x128xf32>
    %cst_48 = arith.constant 8.000000e+00 : f32
    %96 = vector.broadcast %cst_48 : f32 to vector<1x128xf32>
    %97 = arith.subf %91, %96 : vector<1x128xf32>
    %cst_49 = arith.constant 2.51214789E-15 : f32
    %98 = vector.broadcast %cst_49 : f32 to vector<1x128xf32>
    %99 = arith.mulf %98, %93 : vector<1x128xf32>
    %cst_50 = arith.constant -1.000000e+00 : f32
    %100 = vector.broadcast %cst_50 : f32 to vector<1x128xf32>
    %101 = arith.mulf %100, %95 : vector<1x128xf32>
    %102 = arith.addf %99, %101 : vector<1x128xf32>
    %cst_51 = arith.constant 0.000000e+00 : f32
    %103 = vector.broadcast %cst_51 : f32 to vector<1x128xf32>
    %104 = arith.mulf %103, %97 : vector<1x128xf32>
    %105 = arith.addf %102, %104 : vector<1x128xf32>
    %cst_52 = arith.constant -0.707106769 : f32
    %106 = vector.broadcast %cst_52 : f32 to vector<1x128xf32>
    %107 = arith.mulf %106, %93 : vector<1x128xf32>
    %cst_53 = arith.constant -1.77635684E-15 : f32
    %108 = vector.broadcast %cst_53 : f32 to vector<1x128xf32>
    %109 = arith.mulf %108, %95 : vector<1x128xf32>
    %110 = arith.addf %107, %109 : vector<1x128xf32>
    %cst_54 = arith.constant 0.707106769 : f32
    %111 = vector.broadcast %cst_54 : f32 to vector<1x128xf32>
    %112 = arith.mulf %111, %97 : vector<1x128xf32>
    %113 = arith.addf %110, %112 : vector<1x128xf32>
    %cst_55 = arith.constant -0.707106769 : f32
    %114 = vector.broadcast %cst_55 : f32 to vector<1x128xf32>
    %115 = arith.mulf %114, %93 : vector<1x128xf32>
    %cst_56 = arith.constant -1.77635684E-15 : f32
    %116 = vector.broadcast %cst_56 : f32 to vector<1x128xf32>
    %117 = arith.mulf %116, %95 : vector<1x128xf32>
    %118 = arith.addf %115, %117 : vector<1x128xf32>
    %cst_57 = arith.constant -0.707106769 : f32
    %119 = vector.broadcast %cst_57 : f32 to vector<1x128xf32>
    %120 = arith.mulf %119, %97 : vector<1x128xf32>
    %121 = arith.addf %118, %120 : vector<1x128xf32>
    %cst_58 = arith.constant 1.000000e+00 : f32
    %122 = vector.broadcast %cst_58 : f32 to vector<1x128xf32>
    %123 = arith.divf %122, %121 : vector<1x128xf32>
    %124 = arith.mulf %105, %123 : vector<1x128xf32>
    %125 = arith.mulf %113, %123 : vector<1x128xf32>
    %126 = arith.subf %82, %40 : vector<1x128xf32>
    %127 = arith.subf %83, %41 : vector<1x128xf32>
    %128 = arith.subf %124, %40 : vector<1x128xf32>
    %129 = arith.subf %125, %41 : vector<1x128xf32>
    %130 = arith.mulf %126, %129 : vector<1x128xf32>
    %131 = arith.mulf %127, %128 : vector<1x128xf32>
    %132 = arith.subf %130, %131 : vector<1x128xf32>
    %cst_59 = arith.constant 0.000000e+00 : f32
    %133 = vector.broadcast %cst_59 : f32 to vector<1x128xf32>
    %134 = arith.cmpf ogt, %132, %133 : vector<1x128xf32>
    %cst_60 = arith.constant 1.000000e+00 : f32
    %135 = vector.broadcast %cst_60 : f32 to vector<1x128xf32>
    %136 = arith.select %134, %132, %135 : vector<1x128xi1>, vector<1x128xf32>
    %cst_61 = arith.constant 1.000000e+00 : f32
    %137 = vector.broadcast %cst_61 : f32 to vector<1x128xf32>
    %138 = arith.divf %137, %136 : vector<1x128xf32>
    %cst_62 = arith.constant 1.000000e+00 : f32
    %139 = vector.broadcast %cst_62 : f32 to vector<1x128xf32>
    %140 = arith.divf %139, %37 : vector<1x128xf32>
    %cst_63 = arith.constant 1.000000e+00 : f32
    %141 = vector.broadcast %cst_63 : f32 to vector<1x128xf32>
    %142 = arith.divf %141, %79 : vector<1x128xf32>
    %cst_64 = arith.constant 1.000000e+00 : f32
    %143 = vector.broadcast %cst_64 : f32 to vector<1x128xf32>
    %144 = arith.divf %143, %121 : vector<1x128xf32>
    %145 = arith.subf %124, %82 : vector<1x128xf32>
    %146 = arith.subf %125, %83 : vector<1x128xf32>
    %147 = arith.subf %40, %124 : vector<1x128xf32>
    %148 = arith.subf %41, %125 : vector<1x128xf32>
    %149 = arith.mulf %40, %127 : vector<1x128xf32>
    %150 = arith.mulf %41, %126 : vector<1x128xf32>
    %151 = arith.subf %149, %150 : vector<1x128xf32>
    %152 = arith.mulf %82, %146 : vector<1x128xf32>
    %153 = arith.mulf %83, %145 : vector<1x128xf32>
    %154 = arith.subf %152, %153 : vector<1x128xf32>
    %155 = arith.mulf %124, %148 : vector<1x128xf32>
    %156 = arith.mulf %125, %147 : vector<1x128xf32>
    %157 = arith.subf %155, %156 : vector<1x128xf32>
    %158 = arith.subf %83, %125 : vector<1x128xf32>
    %159 = arith.mulf %158, %140 : vector<1x128xf32>
    %160 = arith.subf %125, %41 : vector<1x128xf32>
    %161 = arith.mulf %160, %142 : vector<1x128xf32>
    %162 = arith.addf %159, %161 : vector<1x128xf32>
    %163 = arith.subf %41, %83 : vector<1x128xf32>
    %164 = arith.mulf %163, %144 : vector<1x128xf32>
    %165 = arith.addf %162, %164 : vector<1x128xf32>
    %166 = arith.mulf %165, %138 : vector<1x128xf32>
    %167 = arith.subf %124, %82 : vector<1x128xf32>
    %168 = arith.mulf %167, %140 : vector<1x128xf32>
    %169 = arith.subf %40, %124 : vector<1x128xf32>
    %170 = arith.mulf %169, %142 : vector<1x128xf32>
    %171 = arith.addf %168, %170 : vector<1x128xf32>
    %172 = arith.subf %82, %40 : vector<1x128xf32>
    %173 = arith.mulf %172, %144 : vector<1x128xf32>
    %174 = arith.addf %171, %173 : vector<1x128xf32>
    %175 = arith.mulf %174, %138 : vector<1x128xf32>
    %176 = arith.mulf %82, %125 : vector<1x128xf32>
    %177 = arith.mulf %124, %83 : vector<1x128xf32>
    %178 = arith.subf %176, %177 : vector<1x128xf32>
    %179 = arith.mulf %178, %140 : vector<1x128xf32>
    %180 = arith.mulf %124, %41 : vector<1x128xf32>
    %181 = arith.mulf %40, %125 : vector<1x128xf32>
    %182 = arith.subf %180, %181 : vector<1x128xf32>
    %183 = arith.mulf %182, %142 : vector<1x128xf32>
    %184 = arith.addf %179, %183 : vector<1x128xf32>
    %185 = arith.mulf %40, %83 : vector<1x128xf32>
    %186 = arith.mulf %82, %41 : vector<1x128xf32>
    %187 = arith.subf %185, %186 : vector<1x128xf32>
    %188 = arith.mulf %187, %144 : vector<1x128xf32>
    %189 = arith.addf %184, %188 : vector<1x128xf32>
    %190 = arith.mulf %189, %138 : vector<1x128xf32>
    %cst_65 = arith.constant 0.000000e+00 : f32
    %191 = vector.broadcast %cst_65 : f32 to vector<1x128xf32>
    %cst_66 = arith.constant -1.000000e+00 : f32
    %192 = vector.broadcast %cst_66 : f32 to vector<1x128xf32>
    %193 = arith.select %134, %126, %191 : vector<1x128xi1>, vector<1x128xf32>
    %c0_67 = arith.constant 0 : index
    %c0_68 = arith.constant 0 : index
    %c0_69 = arith.constant 0 : index
    %194 = vector.load %arg2[%c0_67, %c0_68, %c0_69] : memref<1x12x128xf32, #tpu.memory_space<vmem>>, vector<1x1x128xf32>
    %195 = vector.shape_cast %194 : vector<1x1x128xf32> to vector<1x128xf32>
    %196 = vector.shape_cast %193 : vector<1x128xf32> to vector<1x1x128xf32>
    tpu.vector_store %arg2[%c0_67, %c0_68, %c0_69], %196 {strides = array<i32>} : memref<1x12x128xf32, #tpu.memory_space<vmem>>, vector<1x1x128xf32>,
    %cst_70 = arith.constant 0.000000e+00 : f32
    %197 = vector.broadcast %cst_70 : f32 to vector<1x128xf32>
    %198 = arith.subf %197, %127 : vector<1x128xf32>
    %199 = arith.select %134, %198, %191 : vector<1x128xi1>, vector<1x128xf32>
    %c0_71 = arith.constant 0 : index
    %c1_72 = arith.constant 1 : index
    %c0_73 = arith.constant 0 : index
    %200 = vector.load %arg2[%c0_71, %c1_72, %c0_73] : memref<1x12x128xf32, #tpu.memory_space<vmem>>, vector<1x1x128xf32>
    %201 = vector.shape_cast %200 : vector<1x1x128xf32> to vector<1x128xf32>
    %202 = vector.shape_cast %199 : vector<1x128xf32> to vector<1x1x128xf32>
    tpu.vector_store %arg2[%c0_71, %c1_72, %c0_73], %202 {strides = array<i32>} : memref<1x12x128xf32, #tpu.memory_space<vmem>>, vector<1x1x128xf32>,
    %203 = arith.select %134, %151, %192 : vector<1x128xi1>, vector<1x128xf32>
    %c0_74 = arith.constant 0 : index
    %c2_75 = arith.constant 2 : index
    %c0_76 = arith.constant 0 : index
    %204 = vector.load %arg2[%c0_74, %c2_75, %c0_76] : memref<1x12x128xf32, #tpu.memory_space<vmem>>, vector<1x1x128xf32>
    %205 = vector.shape_cast %204 : vector<1x1x128xf32> to vector<1x128xf32>
    %206 = vector.shape_cast %203 : vector<1x128xf32> to vector<1x1x128xf32>
    tpu.vector_store %arg2[%c0_74, %c2_75, %c0_76], %206 {strides = array<i32>} : memref<1x12x128xf32, #tpu.memory_space<vmem>>, vector<1x1x128xf32>,
    %207 = arith.select %134, %145, %191 : vector<1x128xi1>, vector<1x128xf32>
    %c0_77 = arith.constant 0 : index
    %c3_78 = arith.constant 3 : index
    %c0_79 = arith.constant 0 : index
    %208 = vector.load %arg2[%c0_77, %c3_78, %c0_79] : memref<1x12x128xf32, #tpu.memory_space<vmem>>, vector<1x1x128xf32>
    %209 = vector.shape_cast %208 : vector<1x1x128xf32> to vector<1x128xf32>
    %210 = vector.shape_cast %207 : vector<1x128xf32> to vector<1x1x128xf32>
    tpu.vector_store %arg2[%c0_77, %c3_78, %c0_79], %210 {strides = array<i32>} : memref<1x12x128xf32, #tpu.memory_space<vmem>>, vector<1x1x128xf32>,
    %cst_80 = arith.constant 0.000000e+00 : f32
    %211 = vector.broadcast %cst_80 : f32 to vector<1x128xf32>
    %212 = arith.subf %211, %146 : vector<1x128xf32>
    %213 = arith.select %134, %212, %191 : vector<1x128xi1>, vector<1x128xf32>
    %c0_81 = arith.constant 0 : index
    %c4_82 = arith.constant 4 : index
    %c0_83 = arith.constant 0 : index
    %214 = vector.load %arg2[%c0_81, %c4_82, %c0_83] : memref<1x12x128xf32, #tpu.memory_space<vmem>>, vector<1x1x128xf32>
    %215 = vector.shape_cast %214 : vector<1x1x128xf32> to vector<1x128xf32>
    %216 = vector.shape_cast %213 : vector<1x128xf32> to vector<1x1x128xf32>
    tpu.vector_store %arg2[%c0_81, %c4_82, %c0_83], %216 {strides = array<i32>} : memref<1x12x128xf32, #tpu.memory_space<vmem>>, vector<1x1x128xf32>,
    %217 = arith.select %134, %154, %192 : vector<1x128xi1>, vector<1x128xf32>
    %c0_84 = arith.constant 0 : index
    %c5_85 = arith.constant 5 : index
    %c0_86 = arith.constant 0 : index
    %218 = vector.load %arg2[%c0_84, %c5_85, %c0_86] : memref<1x12x128xf32, #tpu.memory_space<vmem>>, vector<1x1x128xf32>
    %219 = vector.shape_cast %218 : vector<1x1x128xf32> to vector<1x128xf32>
    %220 = vector.shape_cast %217 : vector<1x128xf32> to vector<1x1x128xf32>
    tpu.vector_store %arg2[%c0_84, %c5_85, %c0_86], %220 {strides = array<i32>} : memref<1x12x128xf32, #tpu.memory_space<vmem>>, vector<1x1x128xf32>,
    %221 = arith.select %134, %147, %191 : vector<1x128xi1>, vector<1x128xf32>
    %c0_87 = arith.constant 0 : index
    %c6_88 = arith.constant 6 : index
    %c0_89 = arith.constant 0 : index
    %222 = vector.load %arg2[%c0_87, %c6_88, %c0_89] : memref<1x12x128xf32, #tpu.memory_space<vmem>>, vector<1x1x128xf32>
    %223 = vector.shape_cast %222 : vector<1x1x128xf32> to vector<1x128xf32>
    %224 = vector.shape_cast %221 : vector<1x128xf32> to vector<1x1x128xf32>
    tpu.vector_store %arg2[%c0_87, %c6_88, %c0_89], %224 {strides = array<i32>} : memref<1x12x128xf32, #tpu.memory_space<vmem>>, vector<1x1x128xf32>,
    %cst_90 = arith.constant 0.000000e+00 : f32
    %225 = vector.broadcast %cst_90 : f32 to vector<1x128xf32>
    %226 = arith.subf %225, %148 : vector<1x128xf32>
    %227 = arith.select %134, %226, %191 : vector<1x128xi1>, vector<1x128xf32>
    %c0_91 = arith.constant 0 : index
    %c7_92 = arith.constant 7 : index
    %c0_93 = arith.constant 0 : index
    %228 = vector.load %arg2[%c0_91, %c7_92, %c0_93] : memref<1x12x128xf32, #tpu.memory_space<vmem>>, vector<1x1x128xf32>
    %229 = vector.shape_cast %228 : vector<1x1x128xf32> to vector<1x128xf32>
    %230 = vector.shape_cast %227 : vector<1x128xf32> to vector<1x1x128xf32>
    tpu.vector_store %arg2[%c0_91, %c7_92, %c0_93], %230 {strides = array<i32>} : memref<1x12x128xf32, #tpu.memory_space<vmem>>, vector<1x1x128xf32>,
    %231 = arith.select %134, %157, %192 : vector<1x128xi1>, vector<1x128xf32>
    %c0_94 = arith.constant 0 : index
    %c8_95 = arith.constant 8 : index
    %c0_96 = arith.constant 0 : index
    %232 = vector.load %arg2[%c0_94, %c8_95, %c0_96] : memref<1x12x128xf32, #tpu.memory_space<vmem>>, vector<1x1x128xf32>
    %233 = vector.shape_cast %232 : vector<1x1x128xf32> to vector<1x128xf32>
    %234 = vector.shape_cast %231 : vector<1x128xf32> to vector<1x1x128xf32>
    tpu.vector_store %arg2[%c0_94, %c8_95, %c0_96], %234 {strides = array<i32>} : memref<1x12x128xf32, #tpu.memory_space<vmem>>, vector<1x1x128xf32>,
    %235 = arith.select %134, %166, %191 : vector<1x128xi1>, vector<1x128xf32>
    %c0_97 = arith.constant 0 : index
    %c9 = arith.constant 9 : index
    %c0_98 = arith.constant 0 : index
    %236 = vector.load %arg2[%c0_97, %c9, %c0_98] : memref<1x12x128xf32, #tpu.memory_space<vmem>>, vector<1x1x128xf32>
    %237 = vector.shape_cast %236 : vector<1x1x128xf32> to vector<1x128xf32>
    %238 = vector.shape_cast %235 : vector<1x128xf32> to vector<1x1x128xf32>
    tpu.vector_store %arg2[%c0_97, %c9, %c0_98], %238 {strides = array<i32>} : memref<1x12x128xf32, #tpu.memory_space<vmem>>, vector<1x1x128xf32>,
    %239 = arith.select %134, %175, %191 : vector<1x128xi1>, vector<1x128xf32>
    %c0_99 = arith.constant 0 : index
    %c10 = arith.constant 10 : index
    %c0_100 = arith.constant 0 : index
    %240 = vector.load %arg2[%c0_99, %c10, %c0_100] : memref<1x12x128xf32, #tpu.memory_space<vmem>>, vector<1x1x128xf32>
    %241 = vector.shape_cast %240 : vector<1x1x128xf32> to vector<1x128xf32>
    %242 = vector.shape_cast %239 : vector<1x128xf32> to vector<1x1x128xf32>
    tpu.vector_store %arg2[%c0_99, %c10, %c0_100], %242 {strides = array<i32>} : memref<1x12x128xf32, #tpu.memory_space<vmem>>, vector<1x1x128xf32>,
    %243 = arith.select %134, %190, %191 : vector<1x128xi1>, vector<1x128xf32>
    %c0_101 = arith.constant 0 : index
    %c11 = arith.constant 11 : index
    %c0_102 = arith.constant 0 : index
    %244 = vector.load %arg2[%c0_101, %c11, %c0_102] : memref<1x12x128xf32, #tpu.memory_space<vmem>>, vector<1x1x128xf32>
    %245 = vector.shape_cast %244 : vector<1x1x128xf32> to vector<1x128xf32>
    %246 = vector.shape_cast %243 : vector<1x128xf32> to vector<1x1x128xf32>
    tpu.vector_store %arg2[%c0_101, %c11, %c0_102], %246 {strides = array<i32>} : memref<1x12x128xf32, #tpu.memory_space<vmem>>, vector<1x1x128xf32>,
    return
  }
  func.func @transform_0(%arg0: i32) -> (i32, i32, i32) {
    %c0_i32 = arith.constant 0 : i32
    %c0_i32_0 = arith.constant 0 : i32
    %c0_i32_1 = arith.constant 0 : i32
    return %arg0, %c0_i32, %c0_i32_0 : i32, i32, i32
  }
  func.func @transform_1(%arg0: i32) -> (i32, i32, i32) {
    %c0_i32 = arith.constant 0 : i32
    %c0_i32_0 = arith.constant 0 : i32
    %c0_i32_1 = arith.constant 0 : i32
    return %arg0, %c0_i32, %c0_i32_0 : i32, i32, i32
  }
}

</mosaic_0001>

<bundles_post_ra>
// kernel: tpu_custom_call.1
= control target key start
LH: loop header
LB: loop body
LE: loop exit
PB: predicated region body
PF: predicated region fallthrough
CT: control target
= control target key end

     0   :  { %s377_s6 = smov 0   ;;  %s476_s0 = inlined_call_operand.vmem [shape: f32[2,9,128], index: 0, kind: input, shape index: {}]   ;;  %s477_s1 = inlined_call_operand.vmem [shape: f32[2,12,128], index: 1, kind: output, shape index: {}]  }
   0x1 LB: > { %s321_s7 = sadd.s32 4294967295, %s365_s6   ;;  %p325_p0 = scmp.ge.s32.totalorder %s365_s6, 1  ;;  %s365_s6 = sphi %s377_s6, %s11_s6  }
   0x2   : > { %p87_p1 = scmp.lt.s32.totalorder %s365_s6, 3 }
   0x4   : > { %p88_p2 = pnand %p325_p0, %p87_p1 }
   0x5   : > { %p107_p3 = scmp.lt.s32.totalorder (!%p88_p2), %s321_s7, 1 }
   0x6   : > { %91 = sbr.rel (%p88_p2) target bundleno = 73 (0x49), region = 24 }
   0xb   : > { %s479_s7 = smov (!%p107_p3, %s321_s7), 1 }
   0xc   : > { %s341_s8 = sshll.u32 %s479_s7, 4 }
   0xd   : > { %s111_s11 = scalar_lea.vmem %s476_s0, %s341_s8  ;;  %s433_s14 = scalar_lea.vmem %s477_s1, %s341_s8 }
   0xe   : > { %v117_v0 = vld [vmem:[%s111_s11] sm:$0x1]  ;;  %v118_v1 = vld [vmem:[%s111_s11 + $0x1] sm:$0x1]  ;;  %v120_v2 = vld [vmem:[%s111_s11 + $0x2] sm:$0x1] }
   0xf   : > { %v119_v3 = vsub.f32 0.0, %v118_v1  ;;  %v330_v4 = vadd.f32 10.0, %v117_v0  ;;  %v332_v5 = vadd.f32 -8.0, %v120_v2  ;;  %v140_v6 = vld [vmem:[%s111_s11 + $0x3] sm:$0x1] }
  0x10   : > { %v141_v7 = vld [vmem:[%s111_s11 + $0x4] sm:$0x1]  ;;  %v143_v8 = vld [vmem:[%s111_s11 + $0x5] sm:$0x1]  ;;  %v333_v9 = vadd.f32 10.0, %v140_v6 }
  0x11   : > { %v331_v10 = vadd.f32 -6.4, %v119_v3  ;;  %v142_v11 = vsub.f32 0.0, %v141_v7  ;;  %v129_v12 = vmul.f32 -0.70710677, %v330_v4  ;;  %v335_v16 = vadd.f32 -8.0, %v143_v8 }
  0x12   : > { %v134_v14 = vmul.f32 -0.70710677, %v332_v5  ;;  %v152_v17 = vmul.f32 -0.70710677, %v333_v9  ;;  %v163_v19 = vld [vmem:[%s111_s11 + $0x6] sm:$0x1] }
  0x13   : > { %v130_v13 = vmul.f32 -1.7763568e-15, %v331_v10  ;;  %v334_v15 = vadd.f32 -6.4, %v142_v11  ;;  %v164_v20 = vld [vmem:[%s111_s11 + $0x7] sm:$0x1]  ;;  %v336_v27 = vadd.f32 10.0, %v163_v19 }
  0x14   : > { %v166_v21 = vld [vmem:[%s111_s11 + $0x8] sm:$0x1]  ;;  %v157_v23 = vmul.f32 -0.70710677, %v335_v16  ;;  %v165_v24 = vsub.f32 0.0, %v164_v20  ;;  %v125_v36 = vmul.f32 -1.0, %v331_v10 }
  0x15   : > { %v131_v18 = vadd.f32 %v130_v13, %v129_v12  ;;  %v153_v22 = vmul.f32 -1.7763568e-15, %v334_v15  ;;  %v338_v29 = vadd.f32 -8.0, %v166_v21  ;;  %v175_v31 = vmul.f32 -0.70710677, %v336_v27 }
  0x16   : > { %v337_v28 = vadd.f32 -6.4, %v165_v24  ;;  %v124_v35 = vmul.f32 2.5121479e-15, %v330_v4  ;;  %v147_v37 = vmul.f32 2.5121479e-15, %v333_v9 }
  0x17   : > { %v135_v25 = vadd.f32 %v134_v14, %v131_v18  ;;  %v154_v26 = vadd.f32 %v153_v22, %v152_v17  ;;  %v180_v33 = vmul.f32 -0.70710677, %v338_v29  ;;  %v148_v38 = vmul.f32 -1.0, %v334_v15 }
  0x18   : > { %v176_v32 = vmul.f32 -1.7763568e-15, %v337_v28  ;;  %v127_v40 = vmul.f32 0.0, %v332_v5  ;;  %v132_v41 = vmul.f32 0.70710677, %v332_v5  ;;  %v126_v42 = vadd.f32 %v125_v36, %v124_v35 }
  0x19   : > { %351 = vrcp.f32 %v135_v25  ;;  %v158_v30 = vadd.f32 %v157_v23, %v154_v26  ;;  %v149_v43 = vadd.f32 %v148_v38, %v147_v37  ;;  %v150_v44 = vmul.f32 0.0, %v335_v16 }
  0x1a   : > { %v177_v34 = vadd.f32 %v176_v32, %v175_v31  ;;  %v155_v45 = vmul.f32 0.70710677, %v335_v16  ;;  %v170_v46 = vmul.f32 2.5121479e-15, %v336_v27  ;;  %v171_v47 = vmul.f32 -1.0, %v337_v28 }
  0x1b   : > { %353 = vrcp.f32 %v158_v30  ;;  %v128_v48 = vadd.f32 %v127_v40, %v126_v42  ;;  %v133_v49 = vadd.f32 %v132_v41, %v131_v18  ;;  %v151_v50 = vadd.f32 %v150_v44, %v149_v43 }
  0x1c   : > { %v181_v39 = vadd.f32 %v180_v33, %v177_v34  ;;  %v156_v51 = vadd.f32 %v155_v45, %v154_v26  ;;  %v172_v53 = vadd.f32 %v171_v47, %v170_v46  ;;  %v173_v54 = vmul.f32 0.0, %v338_v29 }
  0x1d   : > { %v178_v55 = vmul.f32 0.70710677, %v338_v29 }
  0x1e   : > { %355 = vrcp.f32 %v181_v39  ;;  %v174_v61 = vadd.f32 %v173_v54, %v172_v53 }
  0x1f   : > { %v179_v62 = vadd.f32 %v178_v55, %v177_v34 }
  0x26   : > { %v393_v52 = vpop.eup %351 }
  0x27   : > { %v138_v57 = vmul.f32 %v393_v52, %v128_v48  ;;  %v399_v58 = vmul.f32 %v393_v52, %v133_v49 }
  0x28   : > { %v395_v56 = vpop.eup %353 }
  0x29   : > { %v161_v59 = vmul.f32 %v395_v56, %v151_v50  ;;  %v403_v60 = vmul.f32 %v395_v56, %v156_v51 }
  0x2b   : > { %v405_v63 = vpop.eup %355  ;;  %v407_v0 = vsub.f32 %v161_v59, %v138_v57  ;;  %v187_v1 = vsub.f32 %v403_v60, %v399_v58  ;;  %v214_v6 = vsub.f32 %v399_v58, %v403_v60  ;;  %v418_v7 = vmul.f32 %v403_v60, %v138_v57 }
  0x2c   : > { %v184_v2 = vmul.f32 %v405_v63, %v174_v61  ;;  %v185_v3 = vmul.f32 %v405_v63, %v179_v62  ;;  %v234_v11 = vmul.f32 %v161_v59, %v399_v58 }
  0x2d   : > { %v201_v4 = vmul.f32 %v187_v1, %v138_v57  ;;  %v202_v5 = vmul.f32 %v407_v0, %v399_v58  ;;  %v241_v18 = vsub.f32 0.0, %v187_v1  ;;  %v215_v53 = vmul.f32 %v405_v63, %v214_v6 }
  0x2e   : > { %v188_v8 = vsub.f32 %v184_v2, %v138_v57  ;;  %v189_v9 = vsub.f32 %v185_v3, %v399_v58  ;;  %v198_v10 = vsub.f32 %v185_v3, %v403_v60  ;;  %v197_v12 = vsub.f32 %v184_v2, %v161_v59 }
  0x2f   : > { %v199_v13 = vsub.f32 %v138_v57, %v184_v2  ;;  %v200_v14 = vsub.f32 %v399_v58, %v185_v3  ;;  %v210_v15 = vsub.f32 %v403_v60, %v185_v3  ;;  %v203_v20 = vsub.f32 %v201_v4, %v202_v5 }
  0x30   : > { %v190_v16 = vmul.f32 %v189_v9, %v407_v0  ;;  %v191_v17 = vmul.f32 %v188_v8, %v187_v1  ;;  %v204_v19 = vmul.f32 %v198_v10, %v161_v59  ;;  %v205_v21 = vmul.f32 %v197_v12, %v403_v60 }
  0x31   : > { %v207_v22 = vmul.f32 %v200_v14, %v184_v2  ;;  %v208_v23 = vmul.f32 %v199_v13, %v185_v3  ;;  %v248_v25 = vsub.f32 0.0, %v198_v10  ;;  %v224_v26 = vmul.f32 %v185_v3, %v161_v59 }
  0x32   : > { %v192_v24 = vsub.f32 %v190_v16, %v191_v17  ;;  %v235_v27 = vsub.f32 %v418_v7, %v234_v11  ;;  %v206_v28 = vsub.f32 %v204_v19, %v205_v21  ;;  %v255_v29 = vsub.f32 0.0, %v200_v14 }
  0x33   : > { %v209_v30 = vsub.f32 %v207_v22, %v208_v23  ;;  %v211_v31 = vmul.f32 %v393_v52, %v210_v15  ;;  %v225_v32 = vmul.f32 %v184_v2, %v403_v60  ;;  %v228_v33 = vmul.f32 %v184_v2, %v399_v58 }
  0x34   : > { %vm193_vm0 = vcmp.gt.f32.partialorder %v192_v24, 0.0  ;;  %v229_v34 = vmul.f32 %v185_v3, %v138_v57  ;;  %v212_v45 = vmul.f32 %v395_v56, %v189_v9  ;;  %v218_v46 = vmul.f32 %v393_v52, %v197_v12 }
  0x35   : > { %v194_v35 = vsel %vm193_vm0, %v192_v24, 1.0  ;;  %v239_v36 = vsel %vm193_vm0, %v407_v0, 0.0  ;;  %v242_v37 = vsel %vm193_vm0, %v241_v18, 0.0  ;;  %v244_v38 = vsel %vm193_vm0, %v203_v20, -1.0 }
  0x36   : > { %357 = vrcp.f32 %v194_v35  ;;  %240 = vst [vmem:[%s433_s14] sm:$0x1] %v239_v36  ;;  %243 = vst [vmem:[%s433_s14 + $0x1] sm:$0x1] %v242_v37  ;;  %v246_v39 = vsel %vm193_vm0, %v197_v12, 0.0  ;;  %v249_v40 = vsel %vm193_vm0, %v248_v25, 0.0  ;;  %v251_v41 = vsel %vm193_vm0, %v206_v28, -1.0 }
  0x37   : > { %245 = vst [vmem:[%s433_s14 + $0x2] sm:$0x1] %v244_v38  ;;  %247 = vst [vmem:[%s433_s14 + $0x3] sm:$0x1] %v246_v39  ;;  %v253_v42 = vsel %vm193_vm0, %v199_v13, 0.0  ;;  %v256_v43 = vsel %vm193_vm0, %v255_v29, 0.0  ;;  %v219_v47 = vmul.f32 %v395_v56, %v199_v13  ;;  %v226_v48 = vsub.f32 %v224_v26, %v225_v32 }
  0x38   : > { %250 = vst [vmem:[%s433_s14 + $0x4] sm:$0x1] %v249_v40  ;;  %252 = vst [vmem:[%s433_s14 + $0x5] sm:$0x1] %v251_v41  ;;  %v258_v44 = vsel %vm193_vm0, %v209_v30, -1.0  ;;  %v230_v49 = vsub.f32 %v228_v33, %v229_v34  ;;  %v221_v54 = vmul.f32 %v405_v63, %v407_v0  ;;  %v213_v55 = vadd.f32 %v212_v45, %v211_v31 }
  0x39   : > { %254 = vst [vmem:[%s433_s14 + $0x6] sm:$0x1] %v253_v42  ;;  %257 = vst [vmem:[%s433_s14 + $0x7] sm:$0x1] %v256_v43  ;;  %v227_v50 = vmul.f32 %v393_v52, %v226_v48  ;;  %v220_v57 = vadd.f32 %v219_v47, %v218_v46  ;;  %v236_v59 = vmul.f32 %v405_v63, %v235_v27 }
  0x3a   : > { %259 = vst [vmem:[%s433_s14 + $0x8] sm:$0x1] %v258_v44  ;;  %v231_v51 = vmul.f32 %v395_v56, %v230_v49  ;;  %v216_v60 = vadd.f32 %v215_v53, %v213_v55 }
  0x3b   : > { %v222_v61 = vadd.f32 %v221_v54, %v220_v57 }
  0x3c   : > { %v232_v58 = vadd.f32 %v231_v51, %v227_v50 }
  0x3e   : > { %v237_v62 = vadd.f32 %v236_v59, %v232_v58 }
  0x43   : > { %v358_v1 = vpop.eup %357 }
  0x44   : > { %v217_v52 = vmul.f32 %v358_v1, %v216_v60  ;;  %v223_v2 = vmul.f32 %v358_v1, %v222_v61  ;;  %v238_v56 = vmul.f32 %v358_v1, %v237_v62 }
  0x46   : > { %v260_v3 = vsel %vm193_vm0, %v217_v52, 0.0  ;;  %v262_v4 = vsel %vm193_vm0, %v223_v2, 0.0  ;;  %v264_v0 = vsel %vm193_vm0, %v238_v56, 0.0 }
  0x47   : > { %261 = vst [vmem:[%s433_s14 + $0x9] sm:$0x1] %v260_v3  ;;  %263 = vst [vmem:[%s433_s14 + $0xa] sm:$0x1] %v262_v4 }
  0x48   : > { %265 = vst [vmem:[%s433_s14 + $0xb] sm:$0x1] %v264_v0 }
  0x49 PF: > { %s11_s6 = sadd.s32 1, %s365_s6  }
  0x4a   : > { %p8_p4 = scmp.ge.s32.totalorder %s11_s6, 4  }
  0x4c   :  { %10 = sbr.rel (!%p8_p4) target bundleno = 1 (0x1), region = 54 }

</bundles_post_ra>
